<compile_context>
chip_gen: v6e
topology: v6e:2x2x1
jax: 0.10.0
libtpu: 0.0.40
codegen_flags: <defaults>
</compile_context>

<pallas_src>
import functools

import jax
import jax.numpy as jnp
from jax.experimental import pallas as pl
from jax.experimental.pallas import tpu as pltpu


def _single_output_kernel(x_ref, w_ref, b_ref, o_ref, *, activation):
    # x_ref: [TB, IN], w_ref: [IN, OUT], b_ref: [1, OUT], o_ref: [TB, OUT]
    y = jnp.dot(x_ref[...], w_ref[...], preferred_element_type=jnp.float32)
    y = y + b_ref[...]  # broadcast [1, OUT] over rows
    if activation == "sigmoid":
        y = jax.nn.sigmoid(y)
    elif activation == "tanh":
        y = jnp.tanh(y)
    elif activation == "relu":
        y = jnp.maximum(y, 0.0)
    # activation is None -> identity (matches SingleOutput default).
    o_ref[...] = y.astype(o_ref.dtype)


def single_output(hidden, weight_t, bias2d, activation=None, *, batch_tile=4096):
    """Forward pass of SingleOutput.

    hidden:   [B, IN]   float32
    weight_t: [IN, OUT] float32  (transpose of torch nn.Linear weight [OUT, IN])
    bias2d:   [1, OUT]  float32  (pre-reshaped once at init)
    """
    B, IN = hidden.shape
    IN2, OUT = weight_t.shape
    assert IN == IN2
    assert bias2d.shape == (1, OUT)

    kernel = functools.partial(_single_output_kernel, activation=activation)

    if B <= batch_tile:
        # One-shot kernel: no grid, no pipelining machinery. Everything lives
        # in VMEM for the single invocation; output is stored unpadded.
        return pl.pallas_call(
            kernel,
            out_shape=jax.ShapeDtypeStruct((B, OUT), hidden.dtype),
            in_specs=[
                pl.BlockSpec(memory_space=pltpu.MemorySpace.VMEM),
                pl.BlockSpec(memory_space=pltpu.MemorySpace.VMEM),
                pl.BlockSpec(memory_space=pltpu.MemorySpace.VMEM),
            ],
            out_specs=pl.BlockSpec(memory_space=pltpu.MemorySpace.VMEM),
        )(hidden, weight_t, bias2d)

    # Large batch: tile the batch axis with big row blocks. Round the block
    # count up to an even number so the "parallel" axis splits evenly across
    # v7x's 2 TensorCores, then round the tile to a sublane multiple of 8.
    nblocks = pl.cdiv(B, batch_tile)
    if nblocks > 1 and nblocks % 2 != 0:
        nblocks += 1
    tb = pl.cdiv(B, nblocks)
    tb = ((tb + 7) // 8) * 8
    grid = (pl.cdiv(B, tb),)

    return pl.pallas_call(
        kernel,
        out_shape=jax.ShapeDtypeStruct((B, OUT), hidden.dtype),
        grid_spec=pltpu.PrefetchScalarGridSpec(
            num_scalar_prefetch=0,
            grid=grid,
            in_specs=[
                pl.BlockSpec((tb, IN), lambda i: (i, 0)),
                # Constant block index -> weights/bias stay VMEM-resident.
                pl.BlockSpec((IN, OUT), lambda i: (0, 0)),
                pl.BlockSpec((1, OUT), lambda i: (0, 0)),
            ],
            out_specs=pl.BlockSpec((tb, OUT), lambda i: (i, 0)),
        ),
        compiler_params=pltpu.CompilerParams(
            # "parallel" lets v7x shard the batch axis across its 2 TCs;
            # harmless no-op on single-TC v5e/v6e.
            dimension_semantics=("parallel",),
        ),
    )(hidden, weight_t, bias2d)


def init_single_output_params(key, previous_layer_size, output_size):
    """Deterministic init matching nn.Linear default (uniform +/- 1/sqrt(fan_in)).

    Returns (weight_t [IN, OUT], bias2d [1, OUT]) — all layout prep done here,
    once, so the per-call wrapper issues exactly one pallas_call and nothing else.
    """
    k_w, k_b = jax.random.split(key)
    bound = 1.0 / jnp.sqrt(jnp.float32(previous_layer_size))
    # torch weight is [OUT, IN]; we store it pre-transposed as [IN, OUT].
    weight_t = jax.random.uniform(
        k_w, (previous_layer_size, output_size), jnp.float32, -bound, bound
    )
    bias2d = jax.random.uniform(
        k_b, (1, output_size), jnp.float32, -bound, bound
    )
    return weight_t, bias2d


if __name__ == "__main__":
    key = jax.random.PRNGKey(0)
    k_in, k_in2, k_params = jax.random.split(key, 3)

    previous_layer_size = 32
    output_size = 16
    weight_t, bias2d = init_single_output_params(
        k_params, previous_layer_size, output_size
    )

    # --- Small batch: one-shot (no-grid) path, matches the module's usage. ---
    batch = 8
    hidden = jax.random.normal(k_in, (batch, previous_layer_size), jnp.float32)
    out = single_output(hidden, weight_t, bias2d, activation=None)
    out = jax.block_until_ready(out)
    ref = hidden @ weight_t + bias2d
    assert out.shape == (batch, output_size)
    assert jnp.allclose(out, ref, atol=1e-5, rtol=1e-5)

    # --- Larger batch: batch-tiled path (resident weights, balanced grid). ---
    big_batch = 1040  # not a multiple of the tile -> exercises the partial tile
    hidden_big = jax.random.normal(
        k_in2, (big_batch, previous_layer_size), jnp.float32
    )
    # Force the grid path at this small demo size by lowering batch_tile.
    out_big = single_output(
        hidden_big, weight_t, bias2d, activation=None, batch_tile=256
    )
    out_big = jax.block_until_ready(out_big)
    ref_big = hidden_big @ weight_t + bias2d
    assert out_big.shape == (big_batch, output_size)
    assert jnp.allclose(out_big, ref_big, atol=1e-5, rtol=1e-5)

    # Sanity check an activation variant (sigmoid), small path.
    out_sig = jax.block_until_ready(
        single_output(hidden, weight_t, bias2d, activation="sigmoid")
    )
    assert jnp.allclose(out_sig, jax.nn.sigmoid(ref), atol=1e-5, rtol=1e-5)

    print("KERNEL_OK")
</pallas_src>

<mosaic_0001>
module attributes {stable_mosaic.version = 11 : i64} {
  func.func @_single_output_kernel(%arg0: memref<8x32xf32, #tpu.memory_space<vmem>>, %arg1: memref<32x16xf32, #tpu.memory_space<vmem>>, %arg2: memref<1x16xf32, #tpu.memory_space<vmem>>, %arg3: memref<8x16xf32, #tpu.memory_space<vmem>>) attributes {dimension_semantics = [], scalar_prefetch = 0 : i64, scratch_operands = 0 : i64, tpu.core_type = #tpu.core_type<tc>} {
    %c0 = arith.constant 0 : index
    %c0_0 = arith.constant 0 : index
    %0 = vector.load %arg0[%c0, %c0_0] : memref<8x32xf32, #tpu.memory_space<vmem>>, vector<8x32xf32>
    %c0_1 = arith.constant 0 : index
    %c0_2 = arith.constant 0 : index
    %1 = vector.load %arg1[%c0_1, %c0_2] : memref<32x16xf32, #tpu.memory_space<vmem>>, vector<32x16xf32>
    %cst = arith.constant dense<0.000000e+00> : vector<8x16xf32>
    %2 = tpu.matmul %0, %1, %cst {dimension_numbers = #tpu.dot_dimension_numbers<[1], [0], [0], [1], [0, 0, 1, 1], [], []>} : vector<8x32xf32>, vector<32x16xf32>, vector<8x16xf32> -> vector<8x16xf32>
    %c0_3 = arith.constant 0 : index
    %c0_4 = arith.constant 0 : index
    %3 = vector.load %arg2[%c0_3, %c0_4] : memref<1x16xf32, #tpu.memory_space<vmem>>, vector<1x16xf32>
    %4 = vector.broadcast %3 : vector<1x16xf32> to vector<8x16xf32>
    %5 = arith.addf %2, %4 : vector<8x16xf32>
    %c0_5 = arith.constant 0 : index
    %c0_6 = arith.constant 0 : index
    %6 = vector.load %arg3[%c0_5, %c0_6] : memref<8x16xf32, #tpu.memory_space<vmem>>, vector<8x16xf32>
    tpu.vector_store %arg3[%c0_5, %c0_6], %5 {strides = array<i32>} : memref<8x16xf32, #tpu.memory_space<vmem>>, vector<8x16xf32>,
    return
  }
}

</mosaic_0001>

<bundles_post_ra>
// kernel: tpu_custom_call.1
= control target key start
LH: loop header
LB: loop body
LE: loop exit
PB: predicated region body
PF: predicated region fallthrough
CT: control target
= control target key end

     0   :  { %v160_v1 = vmov 0.0   ;;  %vm161_vm0 = vmmov 0   ;;  %s204_s0 = inlined_call_operand.vmem [shape: f32[8,32], index: 0, kind: input, shape index: {}]   ;;  %s205_s1 = inlined_call_operand.vmem [shape: f32[32,16], index: 1, kind: input, shape index: {}]   ;;  %s206_s2 = inlined_call_operand.vmem [shape: f32[1,16], index: 2, kind: input, shape index: {}]   ;;  %s207_s3 = inlined_call_operand.hbm [shape: f32[8,16], index: 3, kind: output, shape index: {}]  }
   0x1   :  { %v19_v0 = vld [vmem:[%s205_s1 + $0x18] sm:$0xff]  ;;  %124 = vmatprep.subr.mxu0 %v160_v1  ;;  %v18_v2 = vld [vmem:[%s205_s1 + $0x10] sm:$0xff]  ;;  %132 = vmatprep.mubr.msk.f32.mxu0 %vm161_vm0, %v160_v1 }
   0x2   :  { %125 = vmatpush3.msra.mxu0 %v19_v0 }
   0x3   :  { %8 = vsyncpa [#allocation3], 0  ;;  %126 = vmatprep.subr.mxu0 %v160_v1  ;;  %v17_v3 = vld [vmem:[%s205_s1 + $0x8] sm:$0xff]  ;;  %v16_v4 = vld [vmem:[%s205_s1] sm:$0xff]  ;;  %vm27_vm1 = vcmask 261120   ;;  %s162_s24 = smov [#allocation2]  }
   0x4   :  { %127 = vmatpush3.msra.mxu0 %v18_v2  ;;  %v15_v5 = vld [vmem:[%s204_s0] sm:$0xff]  ;;  %s109_s25 = sshll.u32 %s162_s24, 4  ;;  %vm101_vm2 = vcmask 130048   ;;  %s110_s25 = int_to_ptr.vmem [resolvable:$true] %s109_s25 }
   0x5   :  { %128 = vmatprep.subr.mxu0 %v160_v1  ;;  %v117_v6 = vld [vmem:[%s206_s2] ss:$0 sm:$0xff]  ;;  %s138_s1 = scalar_lea.vmem %s110_s25, 128  ;;  %p143_p1 = scmp.lt.s32.totalorder %s110_s25, %s110_s25 }
   0x6   :  { %129 = vmatpush3.msra.mxu0 %v17_v3  ;;  %p139_p0 = scmp.ne.s32.totalorder %s110_s25, %s138_s1  ;;  %p144_p2 = scmp.lt.s32.totalorder %s138_s1, %s138_s1 }
   0x7   :  { %130 = vmatprep.subr.mxu0 %v160_v1 }
   0x8   :  { %131 = vmatpush3.msra.mxu0 %v16_v4  ;;  %p145_p3 = por %p144_p2, %p143_p1 }
   0x9   :  { %133 = vmatmul.mubr.msk.f32.vlgmr.msra.gmra.mxu0 %vm27_vm1, %v15_v5 }
   0xa   :  { %p146_p4 = pnand %p145_p3, %p139_p0 }
  0xc9   :  { %v97_v7 = vpop.f32.mrf.mxu0 }
  0xca   :  { %v98_v8 = vadd.f32 %v117_v6, %v97_v7 }
  0xcb   :  { %v134_v9 = vpop.f32.mrf.mxu0 }
  0xcc   :  { %102 = vst.msk [vmem:[#allocation2] sm:$0xff] %vm101_vm2, %v98_v8 }
  0xcd   :  { %149 = shalt.err (!%p146_p4)
}
  0xce   :  { %112 = dma.vmem_to_hbm [thread:$0]  %s110_s25, 128, %s207_s3, [#allocation3]  }
  0xcf   :  { %158 = dma.done.wait [#allocation3], 128  }
  0xd0   :  { %159 = vsyncadd [#allocation3], 4294967168 }
  0xd1   :  { %116 = vsyncpa [#allocation3], 1 }

</bundles_post_ra>
